<compile_context>
chip_gen: v6e
topology: v6e:2x2x1
jax: 0.10.0
libtpu: 0.0.40
codegen_flags: <defaults>
</compile_context>

<pallas_src>
import math
import functools

import jax
import jax.numpy as jnp
from jax.experimental import pallas as pl
from jax.experimental.pallas import tpu as pltpu

SQRT2 = math.sqrt(2.0)
_VMEM_TILE_BUDGET = 40 * 1024 * 1024   # tile-selection budget
_VMEM_LIMIT_BYTES = 48 * 1024 * 1024   # scoped VMEM ceiling (v7x-safe)


def _round_up(x, m):
    return ((x + m - 1) // m) * m


def _choose_tiles(B, out_dim, in_dim, itemsize, align_m, budget=_VMEM_TILE_BUDGET):
    """Pick (bm, bn, bk): full-K tile, whole-batch M tile, lane-dense N tile
    with >= 2 N-blocks when possible (v7x megacore), under the VMEM budget."""
    Kpad = _round_up(in_dim, 128)
    Npad = _round_up(out_dim, 128)
    Mwhole = _round_up(B, align_m)

    def fits(bm, bn, bk):
        # double-buffered inputs + block-resident (double-buffered) f32 output
        need = (2 * (bm * bk * itemsize + bn * bk * itemsize + bn * 4)
                + 2 * bm * bn * 4)
        return need <= budget

    def divisors_desc(total, unit=128):
        n = total // unit
        return [unit * d for d in range(n, 0, -1) if n % d == 0]

    # 1) K tile: prefer the whole padded K so the reduction grid collapses.
    bk = next(c for c in divisors_desc(Kpad) if fits(align_m, 128, c))

    # 2) M tile: prefer covering the whole batch so W streams from HBM once.
    bm = Mwhole
    while bm > align_m and not fits(bm, 128, bk):
        bm = _round_up(bm // 2, align_m)

    # 3) N tile: divisor of padded N; prefer >= 2 blocks (parallel axis for the
    #    two v7x TensorCores), then prefer larger tiles, under the budget.
    cands = divisors_desc(Npad)
    if Npad >= 256:
        cands = ([c for c in cands if Npad // c >= 2]
                 + [c for c in cands if Npad // c < 2])
    bn = next((c for c in cands if fits(bm, c, bk)), 128)

    return bm, bn, bk


# --------------------------------------------------------------------------
# Pallas kernel
# --------------------------------------------------------------------------
def _equal_linear_kernel(x_ref, w_ref, b_ref, o_ref, *,
                         scale, bias_mul, activation, nk):
    # x tile: (bm, bk), w tile: (bn, bk) -> contract last dims, no transpose.
    part = jax.lax.dot_general(
        x_ref[...], w_ref[...],
        dimension_numbers=(((1,), (1,)), ((), ())),
        preferred_element_type=jnp.float32)

    def finish(acc):
        # equalized-lr scale + bias (+ leaky relu); sqrt(2) already folded
        # into `scale`/`bias_mul` when activation is enabled.
        y = acc * scale + b_ref[...] * bias_mul
        if activation:
            y = jnp.where(y >= 0.0, y, 0.2 * y)
        return y.astype(o_ref.dtype)

    if nk == 1:
        # K grid collapsed: single step, no accumulation branches.
        o_ref[...] = finish(part)
    else:
        k = pl.program_id(2)

        @pl.when(k == 0)
        def _init():
            o_ref[...] = part

        @pl.when(jnp.logical_and(k > 0, k < nk - 1))
        def _acc():
            o_ref[...] = o_ref[...] + part

        @pl.when(k == nk - 1)
        def _epilogue():
            o_ref[...] = finish(o_ref[...] + part)


# --------------------------------------------------------------------------
# Wrapper
# --------------------------------------------------------------------------
def equal_linear(x, weight, bias=None, *, lr_mul=1.0, activation=None,
                 compute_dtype=jnp.bfloat16, bm=None, bn=None, bk=None):
    """EqualLinear forward.

    x: (B, in_dim), weight: (out_dim, in_dim), bias: (out_dim,) or None.
    compute_dtype (default bfloat16) is the MXU operand dtype; accumulation,
    scale, bias and activation stay in f32.  Pass W already stored in
    compute_dtype to avoid any per-call cast of the dominant operand.
    Output is float32.  bm/bn/bk overrides are for testing only.
    """
    B, in_dim = x.shape
    out_dim, in_dim_w = weight.shape
    assert in_dim_w == in_dim

    itemsize = jnp.dtype(compute_dtype).itemsize
    align_m = 16 if itemsize < 4 else 8

    abm, abn, abk = _choose_tiles(B, out_dim, in_dim, itemsize, align_m)
    bm = abm if bm is None else max(align_m,
                                    _round_up(min(bm, _round_up(B, align_m)), align_m))
    bn = abn if bn is None else max(128, _round_up(min(bn, _round_up(out_dim, 128)), 128))
    bk = abk if bk is None else max(128, _round_up(min(bk, _round_up(in_dim, 128)), 128))

    M = _round_up(B, bm)
    N = _round_up(out_dim, bn)
    K = _round_up(in_dim, bk)

    # Cast only when needed; pad only when needed (128-aligned StyleGAN/GPEN
    # dims hit the no-copy path for W).
    xp = x if x.dtype == compute_dtype else x.astype(compute_dtype)
    if (M, K) != (B, in_dim):
        xp = jnp.pad(xp, ((0, M - B), (0, K - in_dim)))
    wp = weight if weight.dtype == compute_dtype else weight.astype(compute_dtype)
    if (N, K) != (out_dim, in_dim):
        wp = jnp.pad(wp, ((0, N - out_dim), (0, K - in_dim)))

    if bias is None:
        # TODO(synk): PyTorch's EqualLinear.forward would raise with bias=None
        # (it multiplies self.bias * lr_mul unconditionally); zero bias here.
        bp = jnp.zeros((1, N), jnp.float32)
    else:
        bp = bias.astype(jnp.float32).reshape(1, out_dim)
        if N != out_dim:
            bp = jnp.pad(bp, ((0, 0), (0, N - out_dim)))

    base_scale = (1.0 / math.sqrt(in_dim)) * lr_mul
    if activation:
        scale, bias_mul = base_scale * SQRT2, lr_mul * SQRT2   # sqrt2 folded
    else:
        scale, bias_mul = base_scale, lr_mul

    grid = (M // bm, N // bn, K // bk)

    out = pl.pallas_call(
        functools.partial(_equal_linear_kernel, scale=scale, bias_mul=bias_mul,
                          activation=bool(activation), nk=grid[2]),
        out_shape=jax.ShapeDtypeStruct((M, N), jnp.float32),
        grid_spec=pltpu.PrefetchScalarGridSpec(
            num_scalar_prefetch=0,
            grid=grid,
            in_specs=[pl.BlockSpec((bm, bk), lambda i, j, k: (i, k)),
                      pl.BlockSpec((bn, bk), lambda i, j, k: (j, k)),
                      pl.BlockSpec((1, bn), lambda i, j, k: (0, j))],
            out_specs=pl.BlockSpec((bm, bn), lambda i, j, k: (i, j))),
        compiler_params=pltpu.CompilerParams(
            dimension_semantics=("parallel", "parallel", "arbitrary"),
            vmem_limit_bytes=_VMEM_LIMIT_BYTES),
    )(xp, wp, bp)

    if (M, N) != (B, out_dim):
        out = out[:B, :out_dim]
    return out


# --------------------------------------------------------------------------
# Pure-JAX reference (mirrors the PyTorch module)
# --------------------------------------------------------------------------
def equal_linear_ref(x, weight, bias, *, lr_mul=1.0, activation=None):
    scale = (1.0 / math.sqrt(x.shape[1])) * lr_mul
    y = x @ (weight * scale).T
    y = y + bias * lr_mul
    if activation:
        y = jnp.where(y >= 0.0, y, 0.2 * y) * SQRT2
    return y


# --------------------------------------------------------------------------
# Test
# --------------------------------------------------------------------------
if __name__ == "__main__":
    key = jax.random.PRNGKey(0)
    k1, k2, k3, k4, k5, k6 = jax.random.split(key, 6)

    # Case 1: plain EqualLinear (no activation), lr_mul=1, bias_init=0, f32 path.
    B, IN, OUT = 2, 32, 64
    x1 = jax.random.normal(k1, (B, IN), jnp.float32)
    w1 = jax.random.normal(k2, (OUT, IN), jnp.float32)
    b1 = jnp.zeros((OUT,), jnp.float32)
    out1 = jax.block_until_ready(
        equal_linear(x1, w1, b1, lr_mul=1.0, activation=None,
                     compute_dtype=jnp.float32))
    ref1 = equal_linear_ref(x1, w1, b1, lr_mul=1.0, activation=None)
    assert out1.shape == (B, OUT)
    assert bool(jnp.allclose(out1, ref1, rtol=1e-4, atol=1e-4))

    # Case 2: style-MLP usage: activation='fused_lrelu', lr_mul=0.01, bias_init=1.
    lr2 = 0.01
    x2 = jax.random.normal(k3, (B, IN), jnp.float32)
    w2 = jax.random.normal(k4, (OUT, IN), jnp.float32) / lr2
    b2 = jnp.ones((OUT,), jnp.float32)
    out2 = jax.block_until_ready(
        equal_linear(x2, w2, b2, lr_mul=lr2, activation="fused_lrelu",
                     compute_dtype=jnp.float32))
    ref2 = equal_linear_ref(x2, w2, b2, lr_mul=lr2, activation="fused_lrelu")
    assert bool(jnp.allclose(out2, ref2, rtol=1e-3, atol=1e-3))

    # Case 3: default bf16 MXU path (f32 accumulate/epilogue), W stored in bf16
    # so the kernel call does no per-call cast/pad of the weight.
    B3, IN3, OUT3 = 16, 512, 256
    x3 = jax.random.normal(k5, (B3, IN3), jnp.float32)
    w3 = jax.random.normal(k6, (OUT3, IN3), jnp.float32)
    b3 = jnp.ones((OUT3,), jnp.float32)
    w3_bf16 = w3.astype(jnp.bfloat16)   # "model-init" cast, done once
    out3 = jax.block_until_ready(
        equal_linear(x3, w3_bf16, b3, lr_mul=1.0, activation="fused_lrelu"))
    ref3 = equal_linear_ref(x3, w3, b3, lr_mul=1.0, activation="fused_lrelu")
    rel_err = float(jnp.max(jnp.abs(out3 - ref3)) / (jnp.max(jnp.abs(ref3)) + 1e-8))
    assert rel_err < 5e-2, rel_err

    # Case 4: force the multi-K accumulation path + multi-block M/N grid
    # (tile overrides), exact f32 numerics.
    out4 = jax.block_until_ready(
        equal_linear(x3, w3, b3, lr_mul=1.0, activation="fused_lrelu",
                     compute_dtype=jnp.float32, bm=8, bn=128, bk=128))
    assert bool(jnp.allclose(out4, ref3, rtol=1e-3, atol=1e-3))

    assert bool(jnp.all(jnp.isfinite(out1)))
    assert bool(jnp.all(jnp.isfinite(out2)))
    assert bool(jnp.all(jnp.isfinite(out3)))
    assert bool(jnp.all(jnp.isfinite(out4)))
    print("KERNEL_OK")
</pallas_src>

<mosaic_0001>
module attributes {stable_mosaic.version = 11 : i64} {
  func.func @_equal_linear_kernel(%arg0: i32, %arg1: i32, %arg2: i32, %arg3: memref<8x128xf32, #tpu.memory_space<vmem>>, %arg4: memref<128x128xf32, #tpu.memory_space<vmem>>, %arg5: memref<1x128xf32, #tpu.memory_space<vmem>>, %arg6: memref<8x128xf32, #tpu.memory_space<vmem>>) attributes {dimension_semantics = [#tpu.dimension_semantics<parallel>, #tpu.dimension_semantics<parallel>, #tpu.dimension_semantics<arbitrary>], iteration_bounds = array<i64: 1, 1, 1>, scalar_prefetch = 0 : i64, scratch_operands = 0 : i64, tpu.core_type = #tpu.core_type<tc>, window_params = [{transform_indices = @transform_0, window_bounds = array<i64: 8, 128>}, {transform_indices = @transform_1, window_bounds = array<i64: 128, 128>}, {transform_indices = @transform_2, window_bounds = array<i64: 1, 128>}, {transform_indices = @transform_3, window_bounds = array<i64: 8, 128>}]} {
    %c0 = arith.constant 0 : index
    %c0_0 = arith.constant 0 : index
    %0 = vector.load %arg3[%c0, %c0_0] : memref<8x128xf32, #tpu.memory_space<vmem>>, vector<8x128xf32>
    %c0_1 = arith.constant 0 : index
    %c0_2 = arith.constant 0 : index
    %1 = vector.load %arg4[%c0_1, %c0_2] : memref<128x128xf32, #tpu.memory_space<vmem>>, vector<128x128xf32>
    %cst = arith.constant dense<0.000000e+00> : vector<8x128xf32>
    %2 = tpu.matmul %0, %1, %cst {dimension_numbers = #tpu.dot_dimension_numbers<[1], [1], [0], [0], [0, 0, 1, 0], [], []>} : vector<8x128xf32>, vector<128x128xf32>, vector<8x128xf32> -> vector<8x128xf32>
    %cst_3 = arith.constant 0.176776692 : f32
    %3 = vector.broadcast %cst_3 : f32 to vector<8x128xf32>
    %4 = arith.mulf %2, %3 : vector<8x128xf32>
    %c0_4 = arith.constant 0 : index
    %c0_5 = arith.constant 0 : index
    %5 = vector.load %arg5[%c0_4, %c0_5] : memref<1x128xf32, #tpu.memory_space<vmem>>, vector<1x128xf32>
    %cst_6 = arith.constant 1.000000e+00 : f32
    %6 = vector.broadcast %cst_6 : f32 to vector<1x128xf32>
    %7 = arith.mulf %5, %6 : vector<1x128xf32>
    %8 = vector.broadcast %7 : vector<1x128xf32> to vector<8x128xf32>
    %9 = arith.addf %4, %8 : vector<8x128xf32>
    %c0_7 = arith.constant 0 : index
    %c0_8 = arith.constant 0 : index
    %10 = vector.load %arg6[%c0_7, %c0_8] : memref<8x128xf32, #tpu.memory_space<vmem>>, vector<8x128xf32>
    tpu.vector_store %arg6[%c0_7, %c0_8], %9 {strides = array<i32>} : memref<8x128xf32, #tpu.memory_space<vmem>>, vector<8x128xf32>,
    return
  }
  func.func @transform_0(%arg0: i32, %arg1: i32, %arg2: i32) -> (i32, i32) {
    %c0_i32 = arith.constant 0 : i32
    return %arg0, %arg2 : i32, i32
  }
  func.func @transform_1(%arg0: i32, %arg1: i32, %arg2: i32) -> (i32, i32) {
    %c0_i32 = arith.constant 0 : i32
    return %arg1, %arg2 : i32, i32
  }
  func.func @transform_2(%arg0: i32, %arg1: i32, %arg2: i32) -> (i32, i32) {
    %c0_i32 = arith.constant 0 : i32
    %c0_i32_0 = arith.constant 0 : i32
    return %c0_i32, %arg1 : i32, i32
  }
  func.func @transform_3(%arg0: i32, %arg1: i32, %arg2: i32) -> (i32, i32) {
    %c0_i32 = arith.constant 0 : i32
    return %arg0, %arg1 : i32, i32
  }
}

</mosaic_0001>

<bundles_post_ra>
// kernel: tpu_custom_call.1
= control target key start
LH: loop header
LB: loop body
LE: loop exit
PB: predicated region body
PF: predicated region fallthrough
CT: control target
= control target key end

     0   :  { %8 = vsyncpa [#allocation3], 0  ;;  %s319_s0 = inlined_call_operand.hbm [shape: f32[8,128], index: 0, kind: input, shape index: {}]   ;;  %s320_s1 = inlined_call_operand.hbm [shape: f32[128,128], index: 1, kind: input, shape index: {}]   ;;  %s321_s2 = inlined_call_operand.vmem [shape: f32[1,128], index: 2, kind: input, shape index: {}]   ;;  %s322_s3 = inlined_call_operand.hbm [shape: f32[8,128], index: 3, kind: output, shape index: {}]  }
   0x1   :  { %9 = vsyncpa [#allocation6], 0 }
   0x2   :  { %10 = vsyncpa [#allocation4], 0  ;;  %s280_s12 = smov [#allocation2]   ;;  %s281_s14 = smov [#allocation5]  }
   0x3   :  { %s17_s13 = sshll.u32 %s280_s12, 4  ;;  %s26_s15 = sshll.u32 %s281_s14, 4  ;;  %s18_s13 = int_to_ptr.vmem [resolvable:$true] %s17_s13  ;;  %s27_s15 = int_to_ptr.vmem [resolvable:$true] %s26_s15 }
   0x4   :  { %s222_s16 = scalar_lea.vmem %s18_s13, 128  ;;  %p227_p1 = scmp.lt.s32.totalorder %s18_s13, %s18_s13 }
   0x5   :  { %p223_p0 = scmp.ne.s32.totalorder %s18_s13, %s222_s16  ;;  %p228_p2 = scmp.lt.s32.totalorder %s222_s16, %s222_s16 }
   0x7   :  { %p229_p3 = por %p228_p2, %p227_p1 }
   0x9   :  { %p230_p4 = pnand %p229_p3, %p223_p0 }
   0xb   :  { %233 = shalt.err (!%p230_p4)
}
   0xc   :  { %20 = dma.hbm_to_vmem [thread:$0]  %s319_s0, 128, %s18_s13, [#allocation3]  }
   0xd   :  { %s242_s19 = scalar_lea.vmem %s27_s15, 2048  ;;  %p247_p6 = scmp.lt.s32.totalorder %s27_s15, %s27_s15 }
   0xe   :  { %p243_p5 = scmp.ne.s32.totalorder %s27_s15, %s242_s19  ;;  %p248_p7 = scmp.lt.s32.totalorder %s242_s19, %s242_s19 }
  0x10   :  { %p249_p8 = por %p248_p7, %p247_p6 }
  0x12   :  { %p250_p9 = pnand %p249_p8, %p243_p5 }
  0x14   :  { %253 = shalt.err (!%p250_p9)
}
  0x15   :  { %s282_s20 = smov 128   ;;  %s283_s21 = smov 8  }
  0x16   :  { %32 = dma.hbm_to_vmem [thread:$0]  %s320_s1, 2048, %s27_s15, [#allocation6], %s282_s20, %s282_s20, %s283_s21  }
  0x17   :  { %274 = dma.done.wait [#allocation3], 128  }
  0x18   :  { %275 = vsyncadd [#allocation3], 4294967168 }
  0x19   :  { %276 = dma.done.wait [#allocation6], 2048  }
  0x1a   :  { %277 = vsyncadd [#allocation6], 4294965248  ;;  %v284_v0 = vmov 0.0   ;;  %vm285_vm0 = vmmov 0   ;;  %v57_v1 = vld [vmem:[#allocation5 + $0x78] sm:$0xff]  ;;  %v56_v2 = vld [vmem:[#allocation5 + $0x70] sm:$0xff] }
  0x1b   :  { %172 = vmatprep.subr.mxu0 %v284_v0  ;;  %204 = vmatprep.mubr.msk.f32.mxu0 %vm285_vm0, %v284_v0  ;;  %v55_v3 = vld [vmem:[#allocation5 + $0x68] sm:$0xff]  ;;  %v54_v4 = vld [vmem:[#allocation5 + $0x60] sm:$0xff]  ;;  %v53_v5 = vld [vmem:[#allocation5 + $0x58] sm:$0xff]  ;;  %s286_s24 = smov [#allocation7]  }
  0x1c   :  { %173 = vmatpush3.xpose.msra.mxu0 %v57_v1  ;;  %v52_v6 = vld [vmem:[#allocation5 + $0x50] sm:$0xff]  ;;  %v51_v7 = vld [vmem:[#allocation5 + $0x48] sm:$0xff]  ;;  %v50_v8 = vld [vmem:[#allocation5 + $0x40] sm:$0xff]  ;;  %s144_s25 = sshll.u32 %s286_s24, 4  ;;  %s145_s25 = int_to_ptr.vmem [resolvable:$true] %s144_s25 }
  0x1d   :  { %174 = vmatprep.subr.mxu0 %v284_v0  ;;  %v49_v9 = vld [vmem:[#allocation5 + $0x38] sm:$0xff]  ;;  %v48_v10 = vld [vmem:[#allocation5 + $0x30] sm:$0xff]  ;;  %v47_v11 = vld [vmem:[#allocation5 + $0x28] sm:$0xff]  ;;  %s254_s26 = scalar_lea.vmem %s145_s25, 128  ;;  %p259_p11 = scmp.lt.s32.totalorder %s145_s25, %s145_s25 }
  0x1e   :  { %v46_v12 = vld [vmem:[#allocation5 + $0x20] sm:$0xff]  ;;  %v45_v13 = vld [vmem:[#allocation5 + $0x18] sm:$0xff]  ;;  %v44_v14 = vld [vmem:[#allocation5 + $0x10] sm:$0xff]  ;;  %p255_p10 = scmp.ne.s32.totalorder %s145_s25, %s254_s26  ;;  %p260_p12 = scmp.lt.s32.totalorder %s254_s26, %s254_s26 }
  0x1f   :  { %v43_v15 = vld [vmem:[#allocation5 + $0x8] sm:$0xff]  ;;  %v42_v16 = vld [vmem:[#allocation5] sm:$0xff]  ;;  %v41_v17 = vld [vmem:[#allocation2] sm:$0xff] }
  0x20   :  { %175 = vmatpush3.xpose.msra.mxu0 %v56_v2  ;;  %v154_v19 = vld [vmem:[%s321_s2] ss:$0 sm:$0xff]  ;;  %p261_p13 = por %p260_p12, %p259_p11 }
  0x21   :  { %176 = vmatprep.subr.mxu0 %v284_v0 }
  0x22   :  { %p262_p0 = pnand %p261_p13, %p255_p10 }
  0x24   :  { %177 = vmatpush3.xpose.msra.mxu0 %v55_v3 }
  0x25   :  { %178 = vmatprep.subr.mxu0 %v284_v0 }
  0x28   :  { %179 = vmatpush3.xpose.msra.mxu0 %v54_v4 }
  0x29   :  { %180 = vmatprep.subr.mxu0 %v284_v0 }
  0x2c   :  { %181 = vmatpush3.xpose.msra.mxu0 %v53_v5 }
  0x2d   :  { %182 = vmatprep.subr.mxu0 %v284_v0 }
  0x30   :  { %183 = vmatpush3.xpose.msra.mxu0 %v52_v6 }
  0x31   :  { %184 = vmatprep.subr.mxu0 %v284_v0 }
  0x34   :  { %185 = vmatpush3.xpose.msra.mxu0 %v51_v7 }
  0x35   :  { %186 = vmatprep.subr.mxu0 %v284_v0 }
  0x38   :  { %187 = vmatpush3.xpose.msra.mxu0 %v50_v8 }
  0x39   :  { %188 = vmatprep.subr.mxu0 %v284_v0 }
  0x3c   :  { %189 = vmatpush3.xpose.msra.mxu0 %v49_v9 }
  0x3d   :  { %190 = vmatprep.subr.mxu0 %v284_v0 }
  0x40   :  { %191 = vmatpush3.xpose.msra.mxu0 %v48_v10 }
  0x41   :  { %192 = vmatprep.subr.mxu0 %v284_v0 }
  0x44   :  { %193 = vmatpush3.xpose.msra.mxu0 %v47_v11 }
  0x45   :  { %194 = vmatprep.subr.mxu0 %v284_v0 }
  0x48   :  { %195 = vmatpush3.xpose.msra.mxu0 %v46_v12 }
  0x49   :  { %196 = vmatprep.subr.mxu0 %v284_v0 }
  0x4c   :  { %197 = vmatpush3.xpose.msra.mxu0 %v45_v13 }
  0x4d   :  { %198 = vmatprep.subr.mxu0 %v284_v0 }
  0x50   :  { %199 = vmatpush3.xpose.msra.mxu0 %v44_v14 }
  0x51   :  { %200 = vmatprep.subr.mxu0 %v284_v0 }
  0x54   :  { %201 = vmatpush3.xpose.msra.mxu0 %v43_v15 }
  0x55   :  { %202 = vmatprep.subr.mxu0 %v284_v0 }
  0x58   :  { %203 = vmatpush3.xpose.msra.mxu0 %v42_v16 }
  0x5b   :  { %205 = vmatmul.mubr.f32.vlgmr.msra.gmra.mxu0 %v41_v17 }
 0x11b   :  { %v124_v18 = vpop.f32.mrf.mxu0 }
 0x11c   :  { %v128_v20 = vmul.f32 0.17677669, %v124_v18 }
 0x11d   :  { %v206_v21 = vpop.f32.mrf.mxu0 }
 0x11e   :  { %v136_v22 = vadd.f32 %v154_v19, %v128_v20 }
 0x120   :  { %137 = vst [vmem:[#allocation7] sm:$0xff] %v136_v22 }
 0x121   :  { %265 = shalt.err (!%p262_p0)
}
 0x122   :  { %147 = dma.vmem_to_hbm [thread:$0]  %s145_s25, 128, %s322_s3, [#allocation4]  }
 0x123   :  { %278 = dma.done.wait [#allocation4], 128  }
 0x124   :  { %279 = vsyncadd [#allocation4], 4294967168 }
 0x125   :  { %151 = vsyncpa [#allocation3], 1 }
 0x126   :  { %152 = vsyncpa [#allocation6], 1 }
 0x127   :  { %153 = vsyncpa [#allocation4], 1 }

</bundles_post_ra>
